<compile_context>
chip_gen: v6e
topology: v6e:2x2x1
jax: 0.10.0
libtpu: 0.0.40
codegen_flags: <defaults>
</compile_context>

<pallas_src>
import jax
import jax.numpy as jnp
from jax import lax
from jax.experimental import pallas as pl
from jax.experimental.pallas import tpu as pltpu


# --------------------------------------------------------------------------
# Tiling plan
# --------------------------------------------------------------------------
def _plan_tiles(S: int, B: int, ts_max: int = 8192, lane: int = 128):
    """Pick the S tile (TS) and padded S (S_pad); TS % 128 == 0, TS | S_pad."""
    s128 = -(-S // lane) * lane              # lane-align S
    if s128 <= ts_max:
        ts = s128
        s_pad = s128
    else:
        n = -(-s128 // ts_max)               # number of S tiles
        ts = -(-s128 // (n * lane)) * lane   # minimal lane-aligned tile
        s_pad = n * ts
    # v7x: keep at least 2 grid steps so both TensorCores get work.
    if B * (s_pad // ts) < 2 and ts % 256 == 0:
        ts //= 2
    return ts, s_pad


def _pick_chunk(ts: int, max_chunk: int = 1024) -> int:
    """Largest lane chunk <= max_chunk that divides TS (both multiples of 128)."""
    units = ts // 128
    best = 1
    for u in range(1, min(units, max_chunk // 128) + 1):
        if units % u == 0:
            best = u
    return best * 128


# --------------------------------------------------------------------------
# Kernel
# --------------------------------------------------------------------------
def _make_kernel(sfloss: float, num_classes: int, ts: int, chunk: int):
    sfloss = float(sfloss)
    C = int(num_classes)
    n_chunks = ts // chunk
    unroll = n_chunks <= 8

    def kernel(logits_ref, tcls_ref, p2_ref, treg_ref, w_ref,
               pred_ref, part_ref):
        # logits_ref : (1, C, TS)  native layout, S on lanes, C on sublanes
        # tcls_ref   : (1, 1, TS)  int32
        # p2_ref     : (1, 1, TS)  float
        # treg_ref   : (1, 1, TS)  float
        # w_ref      : (C, 1)      f32 class weights (lane-broadcastable column)
        # pred_ref   : (1, 1, TS)  int32  (argmax labels)
        # part_ref   : (1, 1, 128) f32    lanes 0..3 = [reg_sq, mask_cnt, ce_num, ce_den]
        w_col = w_ref[...].astype(jnp.float32)                        # (C, 1)
        cls_iota = lax.broadcasted_iota(jnp.int32, (C, chunk), 0)     # (C, CHUNK)

        def body(i, carry):
            reg_sum, mask_cnt, ce_num, ce_den = carry
            start = pl.multiple_of(i * chunk, 128)

            x = logits_ref[0, :, pl.ds(start, chunk)].astype(jnp.float32)  # (C, CHUNK)
            t = tcls_ref[0, :, pl.ds(start, chunk)]                        # (1, CHUNK)
            p2 = p2_ref[0, :, pl.ds(start, chunk)].astype(jnp.float32)     # (1, CHUNK)
            tr = treg_ref[0, :, pl.ds(start, chunk)].astype(jnp.float32)   # (1, CHUNK)

            # Class-axis max + first-index argmax (XLU reductions, no select chain).
            cmax = jnp.max(x, axis=0, keepdims=True)                       # (1, CHUNK)
            is_max = x == cmax
            best = jnp.min(jnp.where(is_max, cls_iota, C), axis=0,
                           keepdims=True).astype(jnp.int32)                # (1, CHUNK)
            pred_ref[0, :, pl.ds(start, chunk)] = best

            # log-softmax denominator (EUP exp, XLU class reduce).
            sumexp = jnp.sum(jnp.exp(x - cmax), axis=0, keepdims=True)     # (1, CHUNK)

            # One-hot gather of the target-class logit and its class weight.
            onehot = cls_iota == t                                         # (C, CHUNK)
            sel_logit = jnp.sum(jnp.where(onehot, x, 0.0), axis=0,
                                keepdims=True)                             # (1, CHUNK)
            sel_w = jnp.sum(jnp.where(onehot, w_col, 0.0), axis=0,
                            keepdims=True)                                 # (1, CHUNK)

            # Masking: rows below sfloss are ignore_index = -1 for the CE branch.
            mask = tr >= sfloss
            maskf = mask.astype(jnp.float32)
            validf = jnp.logical_and(mask, t >= 0).astype(jnp.float32)

            # -log softmax(logits)[target], weighted CE partial sums.
            nll = cmax + jnp.log(sumexp) - sel_logit
            wv = validf * sel_w
            ce_num = ce_num + jnp.sum(wv * nll)
            ce_den = ce_den + jnp.sum(wv)

            # Masked MSE (sum reduction) partial sums.
            diff = (p2 - tr) * maskf
            reg_sum = reg_sum + jnp.sum(diff * diff)
            mask_cnt = mask_cnt + jnp.sum(maskf)
            return reg_sum, mask_cnt, ce_num, ce_den

        zero = jnp.float32(0.0)
        reg_sum, mask_cnt, ce_num, ce_den = lax.fori_loop(
            0, n_chunks, body, (zero, zero, zero, zero), unroll=unroll)

        # Lane-dense partials write (full 128-lane unmasked store).
        lane_id = lax.broadcasted_iota(jnp.int32, (1, 128), 1)
        vec = jnp.where(lane_id == 0, reg_sum, 0.0)
        vec = jnp.where(lane_id == 1, mask_cnt, vec)
        vec = jnp.where(lane_id == 2, ce_num, vec)
        vec = jnp.where(lane_id == 3, ce_den, vec)
        part_ref[0] = vec

    return kernel


# --------------------------------------------------------------------------
# Wrapper
# --------------------------------------------------------------------------
def cross_entropy_loss_two_forward(preds, preds2, target_cls, target_reg,
                                   class_weights, alpha, sfloss):
    """Forward of CrossEntropyLoss_Two with args.loss == 'ce+mse'.

    preds        : (B, C, S) float (f32 or bf16; kept in native dtype on the wire)
    preds2       : (B, 1, S) float
    target_cls   : (B, 1, S) int
    target_reg   : (B, 1, S) float
    class_weights: (C,) float (== [1, 1] + args.weight_version)
    """
    B, C, S = preds.shape
    TS, S_pad = _plan_tiles(S, B)
    CHUNK = _pick_chunk(TS)
    S_tiles = S_pad // TS

    tcls = target_cls.reshape(B, 1, S).astype(jnp.int32)
    p2 = preds2.reshape(B, 1, S)
    treg = target_reg.reshape(B, 1, S).astype(jnp.float32)
    w = class_weights.reshape(C, 1).astype(jnp.float32)

    pad = S_pad - S
    if pad:
        # Padded stations fail the sfloss mask -> contribute exactly 0 everywhere.
        preds_p = jnp.pad(preds, ((0, 0), (0, 0), (0, pad)))
        tcls_p = jnp.pad(tcls, ((0, 0), (0, 0), (0, pad)), constant_values=-1)
        p2_p = jnp.pad(p2, ((0, 0), (0, 0), (0, pad)))
        treg_p = jnp.pad(treg, ((0, 0), (0, 0), (0, pad)),
                         constant_values=float(sfloss) - 1.0)
    else:
        preds_p, tcls_p, p2_p, treg_p = preds, tcls, p2, treg

    kernel = _make_kernel(sfloss, C, TS, CHUNK)

    itemsize = jnp.dtype(preds.dtype).itemsize
    cost = pl.CostEstimate(
        flops=int((4 * C + 12) * B * S_pad),
        transcendentals=int((C + 1) * B * S_pad),
        bytes_accessed=int(B * C * S_pad * itemsize      # logits
                           + 3 * B * S_pad * 4            # tcls / preds2 / treg
                           + B * S_pad * 4                # pred labels out
                           + B * S_tiles * 128 * 4),      # partials out
    )

    pred3, partials = pl.pallas_call(
        kernel,
        out_shape=(
            jax.ShapeDtypeStruct((B, 1, S_pad), jnp.int32),             # pred labels
            jax.ShapeDtypeStruct((B * S_tiles, 1, 128), jnp.float32),   # per-tile partials
        ),
        grid=(B, S_tiles),
        in_specs=[
            pl.BlockSpec((1, C, TS), lambda b, s: (b, 0, s)),   # logits, native layout
            pl.BlockSpec((1, 1, TS), lambda b, s: (b, 0, s)),   # target_cls
            pl.BlockSpec((1, 1, TS), lambda b, s: (b, 0, s)),   # preds2
            pl.BlockSpec((1, 1, TS), lambda b, s: (b, 0, s)),   # target_reg
            pl.BlockSpec((C, 1), lambda b, s: (0, 0)),          # class weights (tiny)
        ],
        out_specs=(
            pl.BlockSpec((1, 1, TS), lambda b, s: (b, 0, s)),
            pl.BlockSpec((1, 1, 128), lambda b, s: (b * S_tiles + s, 0, 0)),
        ),
        compiler_params=pltpu.CompilerParams(
            dimension_semantics=("parallel", "parallel")),
        cost_estimate=cost,
    )(preds_p, tcls_p, p2_p, treg_p, w)

    # Finalize the tiny reduction in the wrapper: keeps both grid axes parallel.
    sums = jnp.sum(partials, axis=(0, 1))                       # (128,)
    loss_reg = sums[0] / sums[1]                                # 0/0 -> NaN, matches torch
    loss_cls = sums[2] / sums[3]
    loss = loss_cls + jnp.asarray(alpha, jnp.float32) * loss_reg

    pred_labels = pred3.reshape(B, S_pad)[:, :S]
    target_labels = tcls.reshape(B, S)
    return loss, loss_cls, loss_reg, pred_labels, target_labels


# --------------------------------------------------------------------------
# Pure-JAX reference (mirrors the PyTorch ce+mse branch)
# --------------------------------------------------------------------------
def _reference(preds, preds2, target_cls, target_reg, class_weights, alpha, sfloss):
    B, C, S = preds.shape
    tcls = target_cls.reshape(B, S).astype(jnp.int32)
    treg = target_reg.reshape(B, S).astype(jnp.float32)
    p2 = preds2.reshape(B, S).astype(jnp.float32)

    mask = treg >= sfloss
    maskf = mask.astype(jnp.float32)
    loss_reg = jnp.sum(((p2 - treg) * maskf) ** 2) / jnp.sum(maskf)

    masked_cls = jnp.where(mask, tcls, -1)
    valid = masked_cls >= 0
    safe = jnp.where(valid, masked_cls, 0)
    logp = jax.nn.log_softmax(preds.astype(jnp.float32), axis=1)    # (B, C, S)
    logp_t = jnp.take_along_axis(logp, safe[:, None, :], axis=1)[:, 0, :]
    wy = class_weights[safe]
    num = jnp.sum(jnp.where(valid, wy * (-logp_t), 0.0))
    den = jnp.sum(jnp.where(valid, wy, 0.0))
    loss_cls = num / den

    loss = loss_cls + alpha * loss_reg
    pred_labels = jnp.argmax(preds, axis=1).astype(jnp.int32)
    return loss, loss_cls, loss_reg, pred_labels, tcls


# TODO(synk): only the 'ce+mse' loss branch of the module is implemented; the
# other branches (focal/gce/nce/... ) reference external loss classes that are
# not part of this spec and are not translated.

if __name__ == "__main__":
    import numpy as np

    # Deterministic synthetic setup (mirrors module __init__):
    #   num_classes = 4, args.weight_version = [2.0, 3.0]  ->  weights [1,1,2,3]
    #   args.alpha = 0.5, args.SFLoss = 0.5
    alpha = 0.5
    sfloss = 0.5
    class_weights = jnp.array([1.0, 1.0, 2.0, 3.0], dtype=jnp.float32)

    def run_case(key, B, C, S):
        k1, k2, k3, k4 = jax.random.split(key, 4)
        preds = jax.random.normal(k1, (B, C, S), dtype=jnp.float32)
        preds2 = jax.random.normal(k2, (B, 1, S), dtype=jnp.float32)
        target_cls = jax.random.randint(k3, (B, 1, S), 0, C, dtype=jnp.int32)
        target_reg = jax.random.uniform(k4, (B, 1, S), dtype=jnp.float32)

        out = cross_entropy_loss_two_forward(
            preds, preds2, target_cls, target_reg, class_weights, alpha, sfloss)
        jax.block_until_ready(out)
        loss, loss_cls, loss_reg, pred_labels, target_labels = out

        r_loss, r_lcls, r_lreg, r_pred, r_tgt = _reference(
            preds, preds2, target_cls, target_reg, class_weights, alpha, sfloss)
        np.testing.assert_allclose(np.asarray(loss), np.asarray(r_loss),
                                   rtol=1e-4, atol=1e-5)
        np.testing.assert_allclose(np.asarray(loss_cls), np.asarray(r_lcls),
                                   rtol=1e-4, atol=1e-5)
        np.testing.assert_allclose(np.asarray(loss_reg), np.asarray(r_lreg),
                                   rtol=1e-4, atol=1e-5)
        np.testing.assert_array_equal(np.asarray(pred_labels), np.asarray(r_pred))
        np.testing.assert_array_equal(np.asarray(target_labels), np.asarray(r_tgt))

    key = jax.random.PRNGKey(0)
    k_a, k_b = jax.random.split(key)
    run_case(k_a, B=2, C=4, S=16)    # small shape consistent with the module (padding path)
    run_case(k_b, B=1, C=4, S=256)   # multi-tile / grid-balance path

    print("KERNEL_OK")
</pallas_src>

<mosaic_0001>
module attributes {stable_mosaic.version = 11 : i64} {
  func.func @kernel(%arg0: i32, %arg1: i32, %arg2: memref<1x4x128xf32, #tpu.memory_space<vmem>>, %arg3: memref<1x1x128xi32, #tpu.memory_space<vmem>>, %arg4: memref<1x1x128xf32, #tpu.memory_space<vmem>>, %arg5: memref<1x1x128xf32, #tpu.memory_space<vmem>>, %arg6: memref<4x1xf32, #tpu.memory_space<vmem>>, %arg7: memref<1x1x128xi32, #tpu.memory_space<vmem>>, %arg8: memref<1x1x128xf32, #tpu.memory_space<vmem>>) attributes {dimension_semantics = [#tpu.dimension_semantics<parallel>, #tpu.dimension_semantics<parallel>], iteration_bounds = array<i64: 2, 1>, scalar_prefetch = 0 : i64, scratch_operands = 0 : i64, tpu.core_type = #tpu.core_type<tc>, window_params = [{transform_indices = @transform_0, window_bounds = array<i64: 1, 4, 128>}, {transform_indices = @transform_1, window_bounds = array<i64: 1, 1, 128>}, {transform_indices = @transform_2, window_bounds = array<i64: 1, 1, 128>}, {transform_indices = @transform_3, window_bounds = array<i64: 1, 1, 128>}, {pipeline_mode = #tpu.pipeline_mode<synchronous>, transform_indices = @transform_4, window_bounds = array<i64: 4, 1>}, {transform_indices = @transform_5, window_bounds = array<i64: 1, 1, 128>}, {transform_indices = @transform_6, window_bounds = array<i64: 1, 1, 128>}]} {
    %c0 = arith.constant 0 : index
    %c0_0 = arith.constant 0 : index
    %0 = vector.load %arg6[%c0, %c0_0] : memref<4x1xf32, #tpu.memory_space<vmem>>, vector<4x1xf32>
    %1 = tpu.iota {dimensions = array<i32: 0>} : vector<4x128xi32>
    %cst = arith.constant 0.000000e+00 : f32
    %cst_1 = arith.constant 0.000000e+00 : f32
    %cst_2 = arith.constant 0.000000e+00 : f32
    %cst_3 = arith.constant 0.000000e+00 : f32
    %c0_i32 = arith.constant 0 : i32
    %c128_i32 = arith.constant 128 : i32
    %2 = arith.muli %c0_i32, %c128_i32 : i32
    %3 = tpu.assume_multiple %2, 128 : i32
    %c0_4 = arith.constant 0 : index
    %c0_5 = arith.constant 0 : index
    %4 = arith.index_cast %3 : i32 to index
    %5 = vector.load %arg2[%c0_4, %c0_5, %4] : memref<1x4x128xf32, #tpu.memory_space<vmem>>, vector<1x4x128xf32>
    %6 = vector.shape_cast %5 : vector<1x4x128xf32> to vector<4x128xf32>
    %c0_6 = arith.constant 0 : index
    %c0_7 = arith.constant 0 : index
    %7 = arith.index_cast %3 : i32 to index
    %8 = vector.load %arg3[%c0_6, %c0_7, %7] : memref<1x1x128xi32, #tpu.memory_space<vmem>>, vector<1x1x128xi32>
    %9 = vector.shape_cast %8 : vector<1x1x128xi32> to vector<1x128xi32>
    %c0_8 = arith.constant 0 : index
    %c0_9 = arith.constant 0 : index
    %10 = arith.index_cast %3 : i32 to index
    %11 = vector.load %arg4[%c0_8, %c0_9, %10] : memref<1x1x128xf32, #tpu.memory_space<vmem>>, vector<1x1x128xf32>
    %12 = vector.shape_cast %11 : vector<1x1x128xf32> to vector<1x128xf32>
    %c0_10 = arith.constant 0 : index
    %c0_11 = arith.constant 0 : index
    %13 = arith.index_cast %3 : i32 to index
    %14 = vector.load %arg5[%c0_10, %c0_11, %13] : memref<1x1x128xf32, #tpu.memory_space<vmem>>, vector<1x1x128xf32>
    %15 = vector.shape_cast %14 : vector<1x1x128xf32> to vector<1x128xf32>
    %cst_12 = arith.constant dense<0xFF800000> : vector<128xf32>
    %16 = vector.multi_reduction <maximumf>, %6, %cst_12 [0] : vector<4x128xf32> to vector<128xf32>
    %17 = vector.shape_cast %16 : vector<128xf32> to vector<1x128xf32>
    %18 = vector.broadcast %17 : vector<1x128xf32> to vector<4x128xf32>
    %19 = arith.cmpf oeq, %6, %18 : vector<4x128xf32>
    %c4_i32 = arith.constant 4 : i32
    %20 = vector.broadcast %c4_i32 : i32 to vector<4x128xi32>
    %21 = arith.select %19, %1, %20 : vector<4x128xi1>, vector<4x128xi32>
    %cst_13 = arith.constant dense<2147483647> : vector<128xi32>
    %22 = vector.multi_reduction <minsi>, %21, %cst_13 [0] : vector<4x128xi32> to vector<128xi32>
    %23 = vector.shape_cast %22 : vector<128xi32> to vector<1x128xi32>
    %c0_14 = arith.constant 0 : index
    %c0_15 = arith.constant 0 : index
    %24 = arith.index_cast %3 : i32 to index
    %25 = vector.load %arg7[%c0_14, %c0_15, %24] : memref<1x1x128xi32, #tpu.memory_space<vmem>>, vector<1x1x128xi32>
    %26 = vector.shape_cast %25 : vector<1x1x128xi32> to vector<1x128xi32>
    %27 = vector.shape_cast %23 : vector<1x128xi32> to vector<1x1x128xi32>
    tpu.vector_store %arg7[%c0_14, %c0_15, %24], %27 {strides = array<i32>} : memref<1x1x128xi32, #tpu.memory_space<vmem>>, vector<1x1x128xi32>,
    %28 = vector.broadcast %17 : vector<1x128xf32> to vector<4x128xf32>
    %29 = arith.subf %6, %28 : vector<4x128xf32>
    %30 = math.exp %29 : vector<4x128xf32>
    %cst_16 = arith.constant dense<0.000000e+00> : vector<128xf32>
    %31 = vector.multi_reduction <add>, %30, %cst_16 [0] : vector<4x128xf32> to vector<128xf32>
    %32 = vector.shape_cast %31 : vector<128xf32> to vector<1x128xf32>
    %33 = vector.broadcast %9 : vector<1x128xi32> to vector<4x128xi32>
    %34 = arith.cmpi eq, %1, %33 : vector<4x128xi32>
    %cst_17 = arith.constant 0.000000e+00 : f32
    %35 = vector.broadcast %cst_17 : f32 to vector<4x128xf32>
    %36 = arith.select %34, %6, %35 : vector<4x128xi1>, vector<4x128xf32>
    %cst_18 = arith.constant dense<0.000000e+00> : vector<128xf32>
    %37 = vector.multi_reduction <add>, %36, %cst_18 [0] : vector<4x128xf32> to vector<128xf32>
    %38 = vector.shape_cast %37 : vector<128xf32> to vector<1x128xf32>
    %cst_19 = arith.constant 0.000000e+00 : f32
    %39 = vector.shape_cast %0 : vector<4x1xf32> to vector<4x1xf32>
    %40 = vector.broadcast %39 : vector<4x1xf32> to vector<4x128xf32>
    %41 = vector.broadcast %cst_19 : f32 to vector<4x128xf32>
    %42 = arith.select %34, %40, %41 : vector<4x128xi1>, vector<4x128xf32>
    %cst_20 = arith.constant dense<0.000000e+00> : vector<128xf32>
    %43 = vector.multi_reduction <add>, %42, %cst_20 [0] : vector<4x128xf32> to vector<128xf32>
    %44 = vector.shape_cast %43 : vector<128xf32> to vector<1x128xf32>
    %cst_21 = arith.constant 5.000000e-01 : f32
    %45 = vector.broadcast %cst_21 : f32 to vector<1x128xf32>
    %46 = arith.cmpf oge, %15, %45 : vector<1x128xf32>
    %47 = arith.extui %46 : vector<1x128xi1> to vector<1x128xi32>
    %48 = arith.sitofp %47 : vector<1x128xi32> to vector<1x128xf32>
    %c0_i32_22 = arith.constant 0 : i32
    %49 = vector.broadcast %c0_i32_22 : i32 to vector<1x128xi32>
    %50 = arith.cmpi sge, %9, %49 : vector<1x128xi32>
    %51 = arith.andi %46, %50 : vector<1x128xi1>
    %52 = arith.extui %51 : vector<1x128xi1> to vector<1x128xi32>
    %53 = arith.sitofp %52 : vector<1x128xi32> to vector<1x128xf32>
    %54 = math.log %32 : vector<1x128xf32>
    %55 = arith.addf %17, %54 : vector<1x128xf32>
    %56 = arith.subf %55, %38 : vector<1x128xf32>
    %57 = arith.mulf %53, %44 : vector<1x128xf32>
    %58 = arith.mulf %57, %56 : vector<1x128xf32>
    %59 = vector.shape_cast %58 : vector<1x128xf32> to vector<1x1x128xf32>
    %cst_23 = arith.constant dense<0.000000e+00> : vector<1xf32>
    %60 = vector.multi_reduction <add>, %59, %cst_23 [1, 2] : vector<1x1x128xf32> to vector<1xf32>
    %61 = vector.shape_cast %60 : vector<1xf32> to vector<1x1x1xf32>
    %62 = vector.extract %61[0, 0, 0] : f32 from vector<1x1x1xf32>
    %63 = arith.addf %cst_2, %62 : f32
    %64 = vector.shape_cast %57 : vector<1x128xf32> to vector<1x1x128xf32>
    %cst_24 = arith.constant dense<0.000000e+00> : vector<1xf32>
    %65 = vector.multi_reduction <add>, %64, %cst_24 [1, 2] : vector<1x1x128xf32> to vector<1xf32>
    %66 = vector.shape_cast %65 : vector<1xf32> to vector<1x1x1xf32>
    %67 = vector.extract %66[0, 0, 0] : f32 from vector<1x1x1xf32>
    %68 = arith.addf %cst_3, %67 : f32
    %69 = arith.subf %12, %15 : vector<1x128xf32>
    %70 = arith.mulf %69, %48 : vector<1x128xf32>
    %71 = arith.mulf %70, %70 : vector<1x128xf32>
    %72 = vector.shape_cast %71 : vector<1x128xf32> to vector<1x1x128xf32>
    %cst_25 = arith.constant dense<0.000000e+00> : vector<1xf32>
    %73 = vector.multi_reduction <add>, %72, %cst_25 [1, 2] : vector<1x1x128xf32> to vector<1xf32>
    %74 = vector.shape_cast %73 : vector<1xf32> to vector<1x1x1xf32>
    %75 = vector.extract %74[0, 0, 0] : f32 from vector<1x1x1xf32>
    %76 = arith.addf %cst, %75 : f32
    %77 = vector.shape_cast %48 : vector<1x128xf32> to vector<1x1x128xf32>
    %cst_26 = arith.constant dense<0.000000e+00> : vector<1xf32>
    %78 = vector.multi_reduction <add>, %77, %cst_26 [1, 2] : vector<1x1x128xf32> to vector<1xf32>
    %79 = vector.shape_cast %78 : vector<1xf32> to vector<1x1x1xf32>
    %80 = vector.extract %79[0, 0, 0] : f32 from vector<1x1x1xf32>
    %81 = arith.addf %cst_1, %80 : f32
    %c1_i32 = arith.constant 1 : i32
    %82 = tpu.iota {dimensions = array<i32: 1>} : vector<1x128xi32>
    %c0_i32_27 = arith.constant 0 : i32
    %83 = vector.broadcast %c0_i32_27 : i32 to vector<1x128xi32>
    %84 = arith.cmpi eq, %82, %83 : vector<1x128xi32>
    %cst_28 = arith.constant 0.000000e+00 : f32
    %85 = vector.broadcast %76 : f32 to vector<1x128xf32>
    %86 = vector.broadcast %cst_28 : f32 to vector<1x128xf32>
    %87 = arith.select %84, %85, %86 : vector<1x128xi1>, vector<1x128xf32>
    %c1_i32_29 = arith.constant 1 : i32
    %88 = vector.broadcast %c1_i32_29 : i32 to vector<1x128xi32>
    %89 = arith.cmpi eq, %82, %88 : vector<1x128xi32>
    %90 = vector.broadcast %81 : f32 to vector<1x128xf32>
    %91 = arith.select %89, %90, %87 : vector<1x128xi1>, vector<1x128xf32>
    %c2_i32 = arith.constant 2 : i32
    %92 = vector.broadcast %c2_i32 : i32 to vector<1x128xi32>
    %93 = arith.cmpi eq, %82, %92 : vector<1x128xi32>
    %94 = vector.broadcast %63 : f32 to vector<1x128xf32>
    %95 = arith.select %93, %94, %91 : vector<1x128xi1>, vector<1x128xf32>
    %c3_i32 = arith.constant 3 : i32
    %96 = vector.broadcast %c3_i32 : i32 to vector<1x128xi32>
    %97 = arith.cmpi eq, %82, %96 : vector<1x128xi32>
    %98 = vector.broadcast %68 : f32 to vector<1x128xf32>
    %99 = arith.select %97, %98, %95 : vector<1x128xi1>, vector<1x128xf32>
    %c0_30 = arith.constant 0 : index
    %c0_31 = arith.constant 0 : index
    %c0_32 = arith.constant 0 : index
    %100 = vector.load %arg8[%c0_30, %c0_31, %c0_32] : memref<1x1x128xf32, #tpu.memory_space<vmem>>, vector<1x1x128xf32>
    %101 = vector.shape_cast %100 : vector<1x1x128xf32> to vector<1x128xf32>
    %102 = vector.shape_cast %99 : vector<1x128xf32> to vector<1x1x128xf32>
    tpu.vector_store %arg8[%c0_30, %c0_31, %c0_32], %102 {strides = array<i32>} : memref<1x1x128xf32, #tpu.memory_space<vmem>>, vector<1x1x128xf32>,
    return
  }
  func.func @transform_0(%arg0: i32, %arg1: i32) -> (i32, i32, i32) {
    %c0_i32 = arith.constant 0 : i32
    %c0_i32_0 = arith.constant 0 : i32
    return %arg0, %c0_i32, %arg1 : i32, i32, i32
  }
  func.func @transform_1(%arg0: i32, %arg1: i32) -> (i32, i32, i32) {
    %c0_i32 = arith.constant 0 : i32
    %c0_i32_0 = arith.constant 0 : i32
    return %arg0, %c0_i32, %arg1 : i32, i32, i32
  }
  func.func @transform_2(%arg0: i32, %arg1: i32) -> (i32, i32, i32) {
    %c0_i32 = arith.constant 0 : i32
    %c0_i32_0 = arith.constant 0 : i32
    return %arg0, %c0_i32, %arg1 : i32, i32, i32
  }
  func.func @transform_3(%arg0: i32, %arg1: i32) -> (i32, i32, i32) {
    %c0_i32 = arith.constant 0 : i32
    %c0_i32_0 = arith.constant 0 : i32
    return %arg0, %c0_i32, %arg1 : i32, i32, i32
  }
  func.func @transform_4(%arg0: i32, %arg1: i32) -> (i32, i32) {
    %c0_i32 = arith.constant 0 : i32
    %c0_i32_0 = arith.constant 0 : i32
    %c0_i32_1 = arith.constant 0 : i32
    return %c0_i32, %c0_i32_0 : i32, i32
  }
  func.func @transform_5(%arg0: i32, %arg1: i32) -> (i32, i32, i32) {
    %c0_i32 = arith.constant 0 : i32
    %c0_i32_0 = arith.constant 0 : i32
    return %arg0, %c0_i32, %arg1 : i32, i32, i32
  }
  func.func @transform_6(%arg0: i32, %arg1: i32) -> (i32, i32, i32) {
    %c1_i32 = arith.constant 1 : i32
    %0 = arith.muli %arg0, %c1_i32 : i32
    %1 = arith.addi %0, %arg1 : i32
    %c0_i32 = arith.constant 0 : i32
    %c0_i32_0 = arith.constant 0 : i32
    %c0_i32_1 = arith.constant 0 : i32
    return %1, %c0_i32, %c0_i32_0 : i32, i32, i32
  }
}

</mosaic_0001>

<bundles_post_ra>
// kernel: tpu_custom_call.1
= control target key start
LH: loop header
LB: loop body
LE: loop exit
PB: predicated region body
PF: predicated region fallthrough
CT: control target
= control target key end

     0   :  { %12 = vsyncpa [#allocation3], 0  ;;  %s1146_s0 = inlined_call_operand.hbm [shape: f32[2,4,128], index: 0, kind: input, shape index: {}]   ;;  %s1147_s1 = inlined_call_operand.vmem [shape: s32[2,1,128], index: 1, kind: input, shape index: {}]   ;;  %s1148_s2 = inlined_call_operand.vmem [shape: f32[2,1,128], index: 2, kind: input, shape index: {}]   ;;  %s1149_s3 = inlined_call_operand.vmem [shape: f32[2,1,128], index: 3, kind: input, shape index: {}]   ;;  %s1150_s4 = inlined_call_operand.vmem [shape: f32[4,1], index: 4, kind: input, shape index: {}]   ;;  %s1151_s5 = inlined_call_operand.hbm [shape: s32[2,1,128], index: 5, kind: output, shape index: {0}]   ;;  %s1152_s6 = inlined_call_operand.hbm [shape: f32[2,1,128], index: 6, kind: output, shape index: {1}]  }
   0x1   :  { %14 = vsyncpa [#allocation3 + $0x1], 0 }
   0x2   :  { %15 = vsyncpa [#allocation4], 0 }
   0x3   :  { %17 = vsyncpa [#allocation4 + $0x1], 0 }
   0x4   :  { %18 = vsyncpa [#allocation7], 0 }
   0x5   :  { %20 = vsyncpa [#allocation7 + $0x1], 0  ;;  %s960_s21 = smov 0   ;;  %s962_s22 = smov 0  }
   0x6   :  { %s964_s23 = smov 0   ;;  %s966_s24 = smov 0  }
   0x7   :  { %s968_s25 = smov 0   ;;  %s970_s26 = smov 0  }
   0x8 LB: > { %s684_s27 = sadd.s32 4294967295, %s918_s26   ;;  %s685_s28 = sadd.s32 4294967294, %s918_s26   ;;  %s918_s26 = sphi %s970_s26, %s26_s26   ;;  %s914_s25 = sphi %s968_s25, %s1166_s25   ;;  %s910_s24 = sphi %s966_s24, %s1165_s24   ;;  %s906_s23 = sphi %s964_s23, %s1164_s23   ;;  %s902_s22 = sphi %s962_s22, %s1163_s22   ;;  %s898_s21 = sphi %s960_s21, %s1162_s21  }
   0x9   : > { %s38_s29 = sadd.s32 1, %s914_s25  ;;  %s47_s30 = sadd.s32 1, %s906_s23 }
   0xa   : > { %p40_p0 = scmp.ge.s32.totalorder %s38_s29, 2  ;;  %p54_p1 = scmp.ne.s32.totalorder %s906_s23, %s902_s22 }
   0xb   : > { %p55_p2 = scmp.eq.s32.totalorder %s918_s26, 0  ;;  %p60_p3 = scmp.ne.s32.totalorder %s902_s22, %s898_s21 }
   0xc   : > { %s1168_s29 = smov (%p40_p0, %s38_s29), 0  ;;  %p61_p5 = scmp.eq.s32.totalorder %s684_s27, 0 }
   0xd   : > { %p1001_p4 = por %p55_p2, %p54_p1  ;;  %s42_s8 = ssub.s32 %s914_s25, %s1168_s29 }
   0xe   : > { %p191_p6 = scmp.eq.s32.totalorder %s684_s27, 1  ;;  %p45_p7 = scmp.eq.s32.totalorder %s42_s8, 0 }
   0xf   : > { %p1007_p8 = por %p61_p5, %p60_p3  ;;  %p197_p10 = scmp.eq.s32.totalorder %s685_s28, 1 }
  0x10   : > { %p1011_p9 = por %p191_p6, %p54_p1  ;;  %p723_p13 = scmp.lt.s32.totalorder %s918_s26, 2 }
  0x11   : > { %s1016_s11 = scalar_select %p45_p7, %s906_s23, %s47_s30  }
  0x12   : > { %p1018_p11 = por %p197_p10, %p60_p3  ;;  %s248_s13 = sand.u32 1, %s906_s23  }
  0x13   : > { %s688_s14 = sshll.u32 %s248_s13, 2  ;;  %s689_s15 = sshll.u32 %s914_s25, 6 }
  0x14   : > { %s1157_s12 = scalar_select %p1018_p11, 1, 0 }
  0x15   : > { %s258_s18 = scalar_lea.hbm %s1146_s0, %s689_s15  ;;  %s252_s19 = scalar_lea.vmem [#allocation2], %s688_s14 }
  0x16   : > { %s260_s20 = sshll.u32 %s252_s19, 4  ;;  %p1031_p0 = pnand %p723_p13, %p1001_p4  ;;  %s261_s20 = int_to_ptr.vmem [resolvable:$true] %s260_s20 }
  0x17   : > { %p690_p1 = scmp.ge.s32.totalorder %s918_s26, 1  ;;  %p292_p2 = scmp.lt.s32.totalorder %s918_s26, 3 }
  0x18   : > { %s249_s28 = scalar_lea.sflag [#allocation3], %s248_s13  ;;  %p782_p3 = pneg %p1031_p0 }
  0x19   : > { %s793_s30 = scalar_lea.vmem %s261_s20, 64  ;;  %s920_s8 = smov [#allocation2]  }
  0x1a   : > { %p794_p5 = scmp.ne.s32.totalorder %s261_s20, %s793_s30  ;;  %s798_s15 = sshll.u32 %s920_s8, 4  ;;  %s799_s15 = int_to_ptr.vmem [resolvable:$false] %s798_s15 }
  0x1b   : > { %s800_s14 = scalar_lea.vmem %s799_s15, 128  ;;  %p801_p10 = scmp.lt.s32.totalorder %s261_s20, %s799_s15 }
  0x1c   : > { %p796_p6 = pnand %p794_p5, %p782_p3  ;;  %p802_p12 = scmp.lt.s32.totalorder %s800_s14, %s793_s30 }
  0x1e   : > { %p797_p7 = pneg %p796_p6  ;;  %p803_p4 = por %p802_p12, %p801_p10 }
  0x20   : > { %p804_p13 = pnand %p803_p4, %p797_p7 }
  0x22   : > { %807 = shalt.err (!%p804_p13)
}
  0x23   : > { %715 = dma.hbm_to_vmem [thread:$0]  (!%p1031_p0), %s258_s18, 64, %s261_s20, %s249_s28  }
  0x24   : > { %p293_p11 = pnand %p690_p1, %p292_p2 }
  0x25   : > { %s1046_s7 = sand.u32 (!%p293_p11), 1, %s902_s22  }
  0x26   : > { %296 = sbr.rel (%p293_p11) target bundleno = 412 (0x19c), region = 40  ;;  %s691_s13 = sshll.u32 (!%p293_p11), %s1046_s7, 2 }
  0x27   : > { %s299_s16 = scalar_lea.sflag (!%p293_p11), [#allocation3], %s1046_s7  ;;  %s302_s17 = scalar_lea.vmem (!%p293_p11), [#allocation2], %s691_s13 }
  0x2b   : > { %885 = dma.done.wait (%p1007_p8), %s299_s16, 64  }
  0x2c   : > { %887 = vsyncadd (%p1007_p8), %s299_s16, 4294967232  ;;  %v921_v0 = vmov 0   ;;  %vm378_vm0 = vcmask 1043456   ;;  %v371_v1 = vld [vmem:[%s1150_s4] sm:$0xf]  ;;  %v372_v8 = vlaneseq  ;;  %p352_p8 = scmp.lt.s32.totalorder %s910_s24, 1 }
  0x2d   : > { %775 = vset.pattern.permute.xlu0 %v921_v0  ;;  %v374_v2 = vld [vmem:[%s302_s17] sm:$0xf]  ;;  %v922_v44 = vmov 0.0   ;;  %vm448_vm6 = vcmask 1040384   ;;  %s1153_s17 = sshll.u32 %s910_s24, 4  ;;  %s345_s18 = scalar_lea.vmem [#allocation5], %s1046_s7 }
  0x2e   : > { %424 = vperm.xlu0 %775, %v371_v1   ;;  %v379_v3 = vsel %vm378_vm0, %v374_v2, -inf  ;;  %v373_v11 = vshrl.u32 %v372_v8, 7  ;;  %s353_s9 = scalar_select %p352_p8, %s910_s24, 1 }
  0x2f   : > { %v380_v4 = vrot.slane %v379_v3, 4  ;;  %s529_s19 = sshll.u32 %s345_s18, 4  ;;  %s527_s27 = scalar_lea.hbm %s1151_s5, %s1153_s17  ;;  %s530_s19 = int_to_ptr.vmem [resolvable:$true] %s529_s19 }
  0x30   : > { %s357_s28 = scalar_lea.vmem %s1147_s1, %s353_s9  ;;  %v411_v19 = vsub.s32 0, %v373_v11  ;;  %s369_s15 = scalar_lea.vmem %s1149_s3, %s353_s9 }
  0x31   : > { %v381_v5 = vmax.f32 %v379_v3, %v380_v4  ;;  %v375_v20 = vld [vmem:[%s357_s28] sm:$0x1]  ;;  %s363_s16 = scalar_lea.vmem %s1148_s2, %s353_s9  ;;  %s512_s28 = scalar_lea.sflag [#allocation4], %s1046_s7 }
  0x32   : > { %v412_v22 = vrot.slane %v375_v20, %v411_v19  ;;  %v377_v37 = vld [vmem:[%s369_s15] sm:$0x1]  ;;  %vm438_vm4 = vcmp.ge.s32.totalorder %v375_v20, 0  ;;  %s808_s30 = scalar_lea.vmem %s530_s19, 16  ;;  %s923_s8 = smov [#allocation5]  }
  0x33   : > { %v382_v6 = vrot.slane %v381_v5, 2  ;;  %v376_v38 = vld [vmem:[%s363_s16] sm:$0x1]  ;;  %vm435_vm3 = vcmp.ge.f32.partialorder %v377_v37, 0.5  ;;  %p809_p11 = scmp.ne.s32.totalorder %s530_s19, %s808_s30  ;;  %s812_s15 = sshll.u32 %s923_s8, 4  ;;  %s813_s15 = int_to_ptr.vmem [resolvable:$false] %s812_s15 }
  0x34   : > { %vm413_vm2 = vcmp.eq.s32.totalorder %v373_v11, %v412_v22  ;;  %v471_v43 = vsub.f32 %v376_v38, %v377_v37  ;;  %v692_v45 = vsel %vm435_vm3, 1.0, %v922_v44  ;;  %vm439_vm5 = vmand %vm435_vm3, %vm438_vm4  ;;  %s814_s14 = scalar_lea.vmem %s813_s15, 32  ;;  %p815_p1 = scmp.lt.s32.totalorder %s530_s19, %s813_s15 }
  0x35   : > { %v383_v7 = vmax.f32 %v381_v5, %v382_v6  ;;  %v414_v25 = vsel %vm413_vm2, %v374_v2, 0.0  ;;  %v693_v51 = vsel %vm439_vm5, 1.0, %v922_v44  ;;  %v485_v60 = vsel %vm448_vm6, %v692_v45, 0.0  ;;  %p810_p12 = pnand %p809_p11, %p1011_p9  ;;  %p816_p2 = scmp.lt.s32.totalorder %s814_s14, %s808_s30 }
  0x36   : > { %v415_v27 = vsel %vm378_vm0, %v414_v25, 0.0  ;;  %v472_v50 = vmul.f32 %v692_v45, %v471_v43 }
  0x37   : > { %v384_v9 = vrot.slane %v383_v7, 1  ;;  %v416_v28 = vrot.slane %v415_v27, 4  ;;  %p811_p0 = pneg %p810_p12  ;;  %p817_p3 = por %p816_p2, %p815_p1 }
  0x38   : > { %v473_v55 = vmul.f32 %v472_v50, %v472_v50 }
  0x39   : > { %v385_v10 = vmax.f32 %v383_v7, %v384_v9  ;;  %v417_v29 = vadd.f32 %v416_v28, %v415_v27  ;;  %p818_p5 = pnand %p817_p3, %p811_p0 }
  0x3a   : > { %v474_v59 = vsel %vm448_vm6, %v473_v55, 0.0 }
  0x3b   : > { %vm386_vm1 = vcmp.eq.f32.partialorder %v374_v2, %v385_v10  ;;  %v399_v13 = vsub.f32 %v374_v2, %v385_v10  ;;  %v418_v30 = vrot.slane %v417_v29, 2 }
  0x3c   : > { %v1059_v12 = vsel %vm386_vm1, %v373_v11, 4 }
  0x3d   : > { %v400_v14 = vmul.f32 1.442695, %v399_v13  ;;  %v419_v32 = vadd.f32 %v418_v30, %v417_v29  ;;  %v388_v61 = vsel %vm378_vm0, %v1059_v12, 2147483647 }
  0x3e   : > { %v389_v62 = vrot.slane %v388_v61, 4 }
  0x3f   : > { %776 = vpow2.f32 %v400_v14  ;;  %v420_v40 = vrot.slane %v419_v32, 1 }
  0x40   : > { %vm390_vm7 = vcmp.lt.s32.totalorder %v388_v61, %v389_v62 }
  0x41   : > { %v421_v47 = vadd.f32 %v420_v40, %v419_v32  ;;  %v391_v63 = vsel %vm390_vm7, %v388_v61, %v389_v62 }
  0x42   : > { %v392_v0 = vrot.slane %v391_v63, 2 }
  0x44   : > { %vm393_vm8 = vcmp.lt.s32.totalorder %v391_v63, %v392_v0 }
  0x45   : > { %v394_v1 = vsel %vm393_vm8, %v391_v63, %v392_v0 }
  0x46   : > { %v395_v2 = vrot.slane %v394_v1, 1 }
  0x48   : > { %vm396_vm9 = vcmp.lt.s32.totalorder %v394_v1, %v395_v2 }
  0x49   : > { %v397_v3 = vsel %vm396_vm9, %v394_v1, %v395_v2 }
  0x4a   : > { %398 = vst [vmem:[%s345_s18] sm:$0x1] %v397_v3 }
  0x4c   : > { %v777_v15 = vpop.eup %776 }
  0x4d   : > { %v402_v16 = vsel %vm378_vm0, %v777_v15, 0.0 }
  0x4e   : > { %v403_v17 = vrot.slane %v402_v16, 4 }
  0x50   : > { %v404_v18 = vadd.f32 %v403_v17, %v402_v16 }
  0x52   : > { %v405_v21 = vrot.slane %v404_v18, 2 }
  0x54   : > { %v406_v23 = vadd.f32 %v405_v21, %v404_v18 }
  0x56   : > { %v407_v24 = vrot.slane %v406_v23, 1 }
  0x58   : > { %v408_v26 = vadd.f32 %v407_v24, %v406_v23 }
  0x5a   : > { %778 = vlog2.f32 %v408_v26 }
  0x67   : > { %v779_v34 = vpop.eup %778 }
  0x68   : > { %v443_v41 = vmul.f32 0.6931472, %v779_v34 }
  0x6a   : > { %v444_v48 = vadd.f32 %v443_v41, %v385_v10 }
  0x6c   : > { %v445_v53 = vsub.f32 %v444_v48, %v421_v47 }
  0xa9   : > { %v425_v31 = vpop.permute.xlu0 %424 }
  0xaa   : > { %v427_v33 = vsel %vm413_vm2, %v425_v31, 0.0 }
  0xab   : > { %v428_v35 = vsel %vm378_vm0, %v427_v33, 0.0 }
  0xac   : > { %v429_v36 = vrot.slane %v428_v35, 4 }
  0xae   : > { %v430_v39 = vadd.f32 %v429_v36, %v428_v35 }
  0xb0   : > { %v431_v42 = vrot.slane %v430_v39, 2 }
  0xb2   : > { %v432_v46 = vadd.f32 %v431_v42, %v430_v39 }
  0xb4   : > { %v433_v49 = vrot.slane %v432_v46, 1 }
  0xb6   : > { %v434_v52 = vadd.f32 %v433_v49, %v432_v46 }
  0xb8   : > { %v446_v54 = vmul.f32 %v693_v51, %v434_v52 }
  0xba   : > { %v460_v56 = vsel %vm448_vm6, %v446_v54, 0.0  ;;  %v447_v57 = vmul.f32 %v446_v54, %v445_v53 }
  0xbb   : > { %461 = vadd.xlane.f32.xlu1 %v460_v56 }
  0xbc   : > { %v449_v58 = vsel %vm448_vm6, %v447_v57, 0.0 }
  0xbd   : > { %450 = vadd.xlane.f32.xlu0 %v449_v58 }
  0xbf   : > { %475 = vadd.xlane.f32.xlu1 %v474_v59 }
  0xc3   : > { %486 = vadd.xlane.f32.xlu1 %v485_v60 }
  0xc4   : > { %821 = shalt.err (!%p818_p5)
}
  0xc5   : > { %s822_s13 = scalar_lea.hbm %s527_s27, 16  ;;  %s826_s9 = scalar_lea.hbm %s1151_s5, 32 }
  0xc6   : > { %p823_p6 = scmp.ne.s32.totalorder %s527_s27, %s822_s13  ;;  %p827_p4 = scmp.lt.s32.totalorder %s527_s27, %s1151_s5 }
  0xc7   : > { %p828_p13 = scmp.lt.s32.totalorder %s826_s9, %s822_s13 }
  0xc8   : > { %p824_p7 = pnand %p823_p6, %p1011_p9 }
  0xc9   : > { %p829_p8 = por %p828_p13, %p827_p4 }
  0xca   : > { %p825_p10 = pneg %p824_p7 }
  0xcc   : > { %p830_p11 = pnand %p829_p8, %p825_p10 }
  0xce   : > { %833 = shalt.err (!%p830_p11)
}
  0xcf   : > { %708 = dma.vmem_to_hbm [thread:$0]  (%p1011_p9), %s530_s19, 16, %s527_s27, %s512_s28   ;;  %v497_v33 = vand.u32 127, %v372_v8 }
  0xd0   : > { %s351_s30 = scalar_lea.vmem [#allocation6], %s1046_s7  ;;  %s1159_s15 = sshll.u32 %s910_s24, 4 }
  0xd1   : > { %vm498_vm10 = vcmp.eq.s32.totalorder %v497_v33, 0  ;;  %vm501_vm11 = vcmp.eq.s32.totalorder %v497_v33, 1  ;;  %vm504_vm12 = vcmp.eq.s32.totalorder %v497_v33, 2  ;;  %s543_s8 = sshll.u32 %s351_s30, 4  ;;  %vm507_vm13 = vcmp.eq.s32.totalorder %v497_v33, 3  ;;  %s1104_s16 = scalar_lea.hbm %s1152_s6, %s1159_s15  ;;  %s544_s8 = int_to_ptr.vmem [resolvable:$true] %s543_s8 }
  0xd2   : > { %s516_s18 = scalar_lea.sflag [#allocation7], %s1046_s7  ;;  %s834_s9 = scalar_lea.vmem %s544_s8, 16 }
  0xd3   : > { %p835_p12 = scmp.ne.s32.totalorder %s544_s8, %s834_s9  ;;  %s924_s20 = smov [#allocation6]  }
  0xd5   : > { %p836_p0 = pnand %p835_p12, %p1011_p9 }
  0xd7   : > { %p837_p1 = pneg %p836_p0 }
 0x144   : > { %v462_v4 = vpop.xlane.xlu1 %461 }
 0x145   : > { %v463_v5 = vrot.slane %v462_v4, 4 }
 0x146   : > { %v451_v6 = vpop.xlane.xlu0 %450 }
 0x147   : > { %v464_v7 = vadd.f32 %v463_v5, %v462_v4  ;;  %v452_v9 = vrot.slane %v451_v6, 4 }
 0x148   : > { %v476_v10 = vpop.xlane.xlu1 %475 }
 0x149   : > { %v465_v11 = vrot.slane %v464_v7, 2  ;;  %v453_v12 = vadd.f32 %v452_v9, %v451_v6  ;;  %v477_v13 = vrot.slane %v476_v10, 4 }
 0x14b   : > { %v454_v14 = vrot.slane %v453_v12, 2  ;;  %v478_v15 = vadd.f32 %v477_v13, %v476_v10  ;;  %v466_v16 = vadd.f32 %v465_v11, %v464_v7 }
 0x14c   : > { %v487_v17 = vpop.xlane.xlu1 %486 }
 0x14d   : > { %v479_v18 = vrot.slane %v478_v15, 2  ;;  %v488_v19 = vrot.slane %v487_v17, 4  ;;  %v455_v20 = vadd.f32 %v454_v14, %v453_v12  ;;  %v467_v21 = vrot.slane %v466_v16, 1 }
 0x14f   : > { %v489_v22 = vadd.f32 %v488_v19, %v487_v17  ;;  %v456_v23 = vrot.slane %v455_v20, 1  ;;  %v480_v24 = vadd.f32 %v479_v18, %v478_v15  ;;  %v468_v28 = vadd.f32 %v467_v21, %v466_v16 }
 0x151   : > { %v490_v25 = vrot.slane %v489_v22, 2  ;;  %v457_v26 = vadd.f32 %v456_v23, %v455_v20  ;;  %v481_v27 = vrot.slane %v480_v24, 1 }
 0x153   : > { %v491_v29 = vadd.f32 %v490_v25, %v489_v22  ;;  %698 = vpush %v457_v26  ;;  %v482_v30 = vadd.f32 %v481_v27, %v480_v24 }
 0x154   : > { %700 = vpush %v468_v28 }
 0x155   : > { %702 = vpush %v482_v30  ;;  %v492_v31 = vrot.slane %v491_v29, 1 }
 0x157   : > { %v493_v32 = vadd.f32 %v492_v31, %v491_v29 }
 0x159   : > { %704 = vpush %v493_v32 }
 0x184   : > { %s699_s17 = spop %698 }
 0x185   : > { %s701_s19 = spop %700  ;;  %v505_v37 = vstv %s699_s17  ;;  %s838_s17 = sshll.u32 %s924_s20, 4  ;;  %s839_s17 = int_to_ptr.vmem [resolvable:$false] %s838_s17 }
 0x186   : > { %s703_s27 = spop %702  ;;  %v508_v39 = vstv %s701_s19  ;;  %s840_s19 = scalar_lea.vmem %s839_s17, 32 }
 0x187   : > { %v499_v34 = vstv %s703_s27  ;;  %p841_p2 = scmp.lt.s32.totalorder %s544_s8, %s839_s17  ;;  %p842_p3 = scmp.lt.s32.totalorder %s840_s19, %s834_s9 }
 0x188   : > { %v500_v35 = vsel %vm498_vm10, %v499_v34, 0.0 }
 0x189   : > { %p843_p5 = por %p842_p3, %p841_p2 }
 0x18a   : > { %s705_s28 = spop %704 }
 0x18b   : > { %v502_v36 = vstv %s705_s28  ;;  %p844_p6 = pnand %p843_p5, %p837_p1 }
 0x18c   : > { %v503_v38 = vsel %vm501_vm11, %v502_v36, %v500_v35 }
 0x18d   : > { %v506_v8 = vsel %vm504_vm12, %v505_v37, %v503_v38 }
 0x18e   : > { %v509_v40 = vsel %vm507_vm13, %v508_v39, %v506_v8 }
 0x18f   : > { %510 = vst [vmem:[%s351_s30] sm:$0x1] %v509_v40 }
 0x190   : > { %847 = shalt.err (!%p844_p6)
}
 0x191   : > { %s848_s24 = scalar_lea.hbm %s1104_s16, 16  ;;  %s852_s28 = scalar_lea.hbm %s1152_s6, 32 }
 0x192   : > { %p849_p7 = scmp.ne.s32.totalorder %s1104_s16, %s848_s24  ;;  %p853_p13 = scmp.lt.s32.totalorder %s1104_s16, %s1152_s6 }
 0x193   : > { %p854_p8 = scmp.lt.s32.totalorder %s852_s28, %s848_s24 }
 0x194   : > { %p850_p10 = pnand %p849_p7, %p1011_p9 }
 0x195   : > { %p855_p11 = por %p854_p8, %p853_p13 }
 0x196   : > { %p851_p4 = pneg %p850_p10 }
 0x198   : > { %p856_p12 = pnand %p855_p11, %p851_p4 }
 0x19a   : > { %859 = shalt.err (!%p856_p12)
}
 0x19b   : > { %709 = dma.vmem_to_hbm [thread:$0]  (%p1011_p9), %s544_s8, 16, %s1104_s16, %s516_s18  }
 0x19c PF: > { %s555_s14 = sand.u32 1, %s898_s21   ;;  %p1160_p0 = scmp.ne.s32.totalorder %s1157_s12, 0 }
 0x19d   : > { %p1161_p1 = scmp.ge.s32.totalorder %s918_s26, 2  ;;  %s556_s13 = scalar_lea.sflag [#allocation4], %s555_s14 }
 0x19f   : > { %p717_p2 = pnand %p1161_p1, %p1160_p0 }
 0x1a1   : > { %p718_p3 = pneg %p717_p2 }
 0x1a3   : > { %889 = dma.done.wait (%p718_p3), %s556_s13, 16  }
 0x1a4   : > { %891 = vsyncadd (%p718_p3), %s556_s13, 4294967280  ;;  %s564_s9 = scalar_lea.sflag [#allocation7], %s555_s14 }
 0x1a5   : > { %893 = dma.done.wait (%p718_p3), %s564_s9, 16  }
 0x1a6   : > { %895 = vsyncadd (%p718_p3), %s564_s9, 4294967280  ;;  %s26_s26 = sadd.s32 1, %s918_s26   ;;  %s1162_s21 = smov %s902_s22 }
 0x1a7   : > { %p23_p5 = scmp.ge.s32.totalorder %s26_s26, 4   ;;  %s1163_s22 = smov %s906_s23 }
 0x1a8   : > { %s1164_s23 = smov %s1016_s11  ;;  %s1165_s24 = smov %s914_s25 }
 0x1a9   : > { %s1166_s25 = smov %s1168_s29  ;;  %25 = sbr.rel (!%p23_p5) target bundleno = 8 (0x8), region = 111 }
 0x1ae   :  { %568 = vsyncpa [#allocation3], 1 }
 0x1af   :  { %570 = vsyncpa [#allocation3 + $0x1], 1 }
 0x1b0   :  { %571 = vsyncpa [#allocation4], 1 }
 0x1b1   :  { %573 = vsyncpa [#allocation4 + $0x1], 1 }
 0x1b2   :  { %574 = vsyncpa [#allocation7], 1 }
 0x1b3   :  { %576 = vsyncpa [#allocation7 + $0x1], 1 }

</bundles_post_ra>
